<compile_context>
chip_gen: v7x
topology: tpu7x:2x2x1
jax: 0.10.0
libtpu: 0.0.40
codegen_flags: <defaults>
</compile_context>

<pallas_src>
import jax
import jax.numpy as jnp
from jax.experimental import pallas as pl
from jax.experimental.pallas import tpu as pltpu


# --------------------------------------------------------------------------- #
# Block-size selection helpers
# --------------------------------------------------------------------------- #
def _round_up(x: int, m: int) -> int:
    return (x + m - 1) // m * m


def _sublane_pack(itemsize: int) -> int:
    # One vreg = (8 sublanes x 128 lanes) of 32-bit words; sub-32-bit dtypes pack
    # along sublanes, so the friendly sublane multiple is 8 / 16 / 32 for
    # 4 / 2 / 1-byte elements.
    return max(8, 32 // max(1, itemsize))


def _vmem_block_target_bytes() -> tuple[int, int]:
    """Returns (per-block target bytes, physical VMEM bytes).

    ~1/16 of physical VMEM per block, clamped to [2 MiB, 6 MiB]:
      128-MiB parts (v5e/v6e) -> 6 MiB blocks, 64-MiB v7x -> 4 MiB blocks.
    With in+out double-buffering that is <= ~26 MiB of scoped VMEM (we raise the
    scoped limit explicitly), leaving headroom on every generation.
    """
    cap = 128 << 20
    try:  # trace-time HW query; fall back to a safe default if unavailable
        info = pltpu.get_tpu_info()
        cap = int(getattr(info, "vmem_capacity_bytes", cap)) or cap
    except Exception:
        pass
    return max(2 << 20, min(6 << 20, cap // 16)), cap


def _pick_blocks(B: int, groups: int, cpg: int, HW: int, itemsize: int,
                 target_bytes: int):
    """Choose (b_blk, cg_blk) so that one block (max of in/out, including VMEM
    lane/sublane padding) stays under target_bytes while the trailing two dims of
    every BlockSpec satisfy the (8,128)-or-full-dim tiling rule."""
    pack = _sublane_pack(itemsize)
    lane_in = _round_up(HW, 128)
    lane_out = _round_up(groups * HW, 128)

    def block_bytes(b_blk: int, cg_blk: int) -> int:
        cg_pad = _round_up(cg_blk, pack)
        in_b = b_blk * groups * cg_pad * lane_in * itemsize
        out_b = b_blk * cg_pad * lane_out * itemsize
        return max(in_b, out_b)

    # Legal channel blocks: divisors of cpg that are multiples of the sublane
    # pack, plus cpg itself (a full dim is always a legal trailing block dim).
    divisors = [d for d in range(1, cpg + 1) if cpg % d == 0]
    packed = [d for d in divisors if d % pack == 0]
    packed_under = [d for d in packed if block_bytes(1, d) <= target_bytes]

    if block_bytes(1, cpg) <= target_bytes:
        cg_blk = cpg                      # whole group slab fits -> fewest steps
    elif packed_under:
        cg_blk = max(packed_under)        # largest legal sub-block under the cap
    elif packed:
        cg_blk = min(packed)              # nothing fits; minimize VMEM, raise limit
    else:
        cg_blk = cpg                      # no packed divisor at all; full dim is legal

    # If a whole per-batch slab fits, also merge batches into one step to
    # amortize the ~0.35 us/step grid overhead (naturally yields a single-shot
    # copy for small tensors).
    b_blk = 1
    if cg_blk == cpg:
        for d in range(B, 0, -1):
            if B % d == 0 and block_bytes(d, cpg) <= target_bytes:
                b_blk = d
                break
    return b_blk, cg_blk, block_bytes(b_blk, cg_blk)


# --------------------------------------------------------------------------- #
# Kernel
# --------------------------------------------------------------------------- #
def _make_shuffle_kernel(groups: int, HW: int):
    if groups <= 64:
        def kernel(x_ref, o_ref):
            # x_ref: (b_blk, groups, cg_blk, HW)    o_ref: (b_blk, cg_blk, groups*HW)
            # Contiguous HBM read / contiguous HBM write; the (g, cg) -> (cg, g)
            # shuffle happens here in VMEM as `groups` static lane-slab stores.
            for g in range(groups):
                o_ref[:, :, g * HW:(g + 1) * HW] = x_ref[:, g, :, :]
    else:
        # Rare corner (very large `groups`): avoid a huge unrolled store loop and
        # let Mosaic lower a value-level relayout instead.
        def kernel(x_ref, o_ref):
            x = x_ref[...]
            b_blk, _, cg_blk, _ = x.shape
            o_ref[...] = jnp.swapaxes(x, 1, 2).reshape(b_blk, cg_blk, groups * HW)
    return kernel


# --------------------------------------------------------------------------- #
# Public wrapper
# --------------------------------------------------------------------------- #
def channel_shuffle(x: jax.Array, groups: int) -> jax.Array:
    """Pallas TPU channel shuffle. x: (B, C, H, W), C % groups == 0."""
    groups = int(groups)
    B, C, H, W = x.shape
    assert C % groups == 0, "num_channels must be divisible by groups"
    cpg = C // groups
    HW = H * W
    itemsize = x.dtype.itemsize

    target, vmem_cap = _vmem_block_target_bytes()
    b_blk, cg_blk, blk_bytes = _pick_blocks(B, groups, cpg, HW, itemsize, target)
    nb = B // b_blk
    n_cg = cpg // cg_blk

    # Free view of the contiguous NCHW input: xg[b, g, cg, hw] = x[b, g*cpg+cg, h, w].
    xg = x.reshape(B, groups, cpg, HW)

    # in + out, double-buffered, plus headroom; clamp below physical VMEM.
    vmem_limit = 4 * blk_bytes + (2 << 20)
    vmem_limit = int(min(max(vmem_limit, 16 << 20), max(16 << 20, vmem_cap - (8 << 20))))

    out = pl.pallas_call(
        _make_shuffle_kernel(groups, HW),
        out_shape=jax.ShapeDtypeStruct((B, cpg, groups * HW), x.dtype),
        grid=(nb, n_cg),
        in_specs=[
            # Read: x[b-block, :, kc-block, :] -> `groups` contiguous runs of
            # cg_blk*HW elements (fully contiguous when cg_blk == cpg).
            pl.BlockSpec((b_blk, groups, cg_blk, HW),
                         lambda b, kc: (b, 0, kc, 0)),
        ],
        # Write: one contiguous (b_blk, cg_blk, groups*HW) slab; trailing block
        # dims are (cg_blk, groups*HW) = (multiple-of-pack-or-full, full) -> legal
        # tiling, lane-dense, no sublane padding.
        out_specs=pl.BlockSpec((b_blk, cg_blk, groups * HW),
                               lambda b, kc: (b, kc, 0)),
        compiler_params=pltpu.CompilerParams(
            dimension_semantics=("parallel", "parallel"),
            vmem_limit_bytes=vmem_limit,
        ),
    )(xg)

    # (B, cpg, groups*HW) flattened row-major is exactly channel order cg*groups+g.
    # TODO(synk): torch's .contiguous(memory_format=channels_last) is a stride-only
    # change with no JAX equivalent; values returned here are identical.
    return out.reshape(B, C, H, W)


def channel_shuffle_ref(x: jax.Array, groups: int) -> jax.Array:
    """Pure-JAX reference mirroring the PyTorch module."""
    B, C, H, W = x.shape
    cpg = C // groups
    y = x.reshape(B, groups, cpg, H, W)
    y = jnp.transpose(y, (0, 2, 1, 3, 4))
    return y.reshape(B, C, H, W)


if __name__ == "__main__":
    key = jax.random.PRNGKey(0)
    B, C, H, W = 2, 4, 16, 16
    groups = 2

    x = jax.random.normal(key, (B, C, H, W), dtype=jnp.float32)

    out = channel_shuffle(x, groups)
    out = jax.block_until_ready(out)

    ref = channel_shuffle_ref(x, groups)
    assert out.shape == (B, C, H, W)
    assert out.dtype == x.dtype
    # Pure permutation copy: results must match bit-exactly.
    assert bool(jnp.array_equal(out, ref)), "Pallas channel shuffle mismatch vs reference"

    print("KERNEL_OK")
</pallas_src>

<mosaic_0001>
module attributes {stable_mosaic.version = 11 : i64} {
  func.func @kernel(%arg0: i32, %arg1: i32, %arg2: memref<2x2x2x256xf32, #tpu.memory_space<vmem>>, %arg3: memref<2x2x512xf32, #tpu.memory_space<vmem>>) attributes {dimension_semantics = [#tpu.dimension_semantics<parallel>, #tpu.dimension_semantics<parallel>], iteration_bounds = array<i64: 1, 1>, scalar_prefetch = 0 : i64, scratch_operands = 0 : i64, tpu.core_type = #tpu.core_type<tc>, window_params = [{transform_indices = @transform_0, window_bounds = array<i64: 2, 2, 2, 256>}, {transform_indices = @transform_1, window_bounds = array<i64: 2, 2, 512>}]} {
    %c0 = arith.constant 0 : index
    %c0_0 = arith.constant 0 : index
    %c0_1 = arith.constant 0 : index
    %c0_2 = arith.constant 0 : index
    %0 = vector.load %arg2[%c0, %c0_0, %c0_1, %c0_2] : memref<2x2x2x256xf32, #tpu.memory_space<vmem>>, vector<2x1x2x256xf32>
    %1 = vector.shape_cast %0 : vector<2x1x2x256xf32> to vector<2x2x256xf32>
    %c0_3 = arith.constant 0 : index
    %c0_4 = arith.constant 0 : index
    %c0_5 = arith.constant 0 : index
    %2 = vector.load %arg3[%c0_3, %c0_4, %c0_5] : memref<2x2x512xf32, #tpu.memory_space<vmem>>, vector<2x2x256xf32>
    tpu.vector_store %arg3[%c0_3, %c0_4, %c0_5], %1 {strides = array<i32>} : memref<2x2x512xf32, #tpu.memory_space<vmem>>, vector<2x2x256xf32>,
    %c0_6 = arith.constant 0 : index
    %c1 = arith.constant 1 : index
    %c0_7 = arith.constant 0 : index
    %c0_8 = arith.constant 0 : index
    %3 = vector.load %arg2[%c0_6, %c1, %c0_7, %c0_8] : memref<2x2x2x256xf32, #tpu.memory_space<vmem>>, vector<2x1x2x256xf32>
    %4 = vector.shape_cast %3 : vector<2x1x2x256xf32> to vector<2x2x256xf32>
    %c0_9 = arith.constant 0 : index
    %c0_10 = arith.constant 0 : index
    %c256 = arith.constant 256 : index
    %5 = vector.load %arg3[%c0_9, %c0_10, %c256] : memref<2x2x512xf32, #tpu.memory_space<vmem>>, vector<2x2x256xf32>
    tpu.vector_store %arg3[%c0_9, %c0_10, %c256], %4 {strides = array<i32>} : memref<2x2x512xf32, #tpu.memory_space<vmem>>, vector<2x2x256xf32>,
    return
  }
  func.func @transform_0(%arg0: i32, %arg1: i32) -> (i32, i32, i32, i32) {
    %c0_i32 = arith.constant 0 : i32
    %c0_i32_0 = arith.constant 0 : i32
    %c0_i32_1 = arith.constant 0 : i32
    return %arg0, %c0_i32, %arg1, %c0_i32_0 : i32, i32, i32, i32
  }
  func.func @transform_1(%arg0: i32, %arg1: i32) -> (i32, i32, i32) {
    %c0_i32 = arith.constant 0 : i32
    %c0_i32_0 = arith.constant 0 : i32
    return %arg0, %arg1, %c0_i32 : i32, i32, i32
  }
}

</mosaic_0001>

<bundles_post_ra>
// kernel: tpu_custom_call.1
= control target key start
LH: loop header
LB: loop body
LE: loop exit
PB: predicated region body
PF: predicated region fallthrough
CT: control target
= control target key end

     0   :  { %6 = vsyncpa [#allocation3], 0  ;;  %s143_s0 = inlined_call_operand.hbm [shape: f32[2,2,2,256], index: 0, kind: input, shape index: {}]   ;;  %s144_s1 = inlined_call_operand.hbm [shape: f32[2,2,512], index: 1, kind: output, shape index: {}]  }
   0x1   :  { %7 = vsyncpa [#allocation4], 0  ;;  %s103_s6 = smov [#allocation2]   ;;  %s55_s10 = scalar_lea.hbm %s143_s0, 256 }
   0x2   :  { %s13_s7 = sshll.u32 %s103_s6, 4  ;;  %p56_p0 = scmp.ne.s32.totalorder %s143_s0, %s55_s10  ;;  %s14_s7 = int_to_ptr.vmem [resolvable:$true] %s13_s7 }
   0x3   :  { %p59_p1 = scmp.lt.u32.totalorder %s55_s10, %s143_s0 }
   0x5   :  { %p61_p2 = pnand %p59_p1, %p56_p0 }
   0x7   :  { %64 = shalt.err (!%p61_p2)
}
   0x8   :  { %s65_s15 = scalar_lea.vmem %s14_s7, 256  ;;  %p70_p4 = scmp.lt.s32.totalorder %s14_s7, %s14_s7 }
   0x9   :  { %p66_p3 = scmp.ne.s32.totalorder %s14_s7, %s65_s15  ;;  %p71_p5 = scmp.lt.s32.totalorder %s65_s15, %s65_s15 }
   0xb   :  { %p72_p6 = por %p71_p5, %p70_p4 }
   0xd   :  { %p73_p7 = pnand %p72_p6, %p66_p3 }
   0xf   :  { %76 = shalt.err (!%p73_p7)
}
  0x10   :  { %s104_s16 = smov 64   ;;  %s105_s17 = smov 4  }
  0x11   :  { %19 = dma.hbm_to_vmem [thread:$0]  %s143_s0, 256, %s14_s7, [#allocation3], %s104_s16, %s104_s16, %s105_s17  }
  0x12   :  { %99 = dma.done.wait [#allocation3], 256  }
  0x13   :  { %100 = vsyncadd [#allocation3], 4294967040  ;;  %s106_s20 = smov [#allocation5]   ;;  %v23_v0 = vld [vmem:[#allocation2] sm:$0xff]   ;;  %v24_v1 = vld [vmem:[#allocation2 + $0x8] sm:$0xff]  }
  0x14   :  { %s37_s21 = sshll.u32 %s106_s20, 4  ;;  %25 = vst [vmem:[#allocation5] sm:$0xff] %v23_v0   ;;  %26 = vst [vmem:[#allocation5 + $0x8] sm:$0xff] %v24_v1   ;;  %s38_s21 = int_to_ptr.vmem [resolvable:$true] %s37_s21 }
  0x15   :  { %s77_s22 = scalar_lea.vmem %s38_s21, 256  ;;  %p82_p9 = scmp.lt.s32.totalorder %s38_s21, %s38_s21 }
  0x16   :  { %p78_p8 = scmp.ne.s32.totalorder %s38_s21, %s77_s22  ;;  %p83_p10 = scmp.lt.s32.totalorder %s77_s22, %s77_s22 }
  0x18   :  { %p84_p11 = por %p83_p10, %p82_p9 }
  0x1a   :  { %p85_p12 = pnand %p84_p11, %p78_p8 }
  0x1c   :  { %88 = shalt.err (!%p85_p12)
}
  0x1d   :  { %s89_s0 = scalar_lea.hbm %s144_s1, 256 }
  0x1e   :  { %p90_p13 = scmp.ne.s32.totalorder %s144_s1, %s89_s0  ;;  %p93_p0 = scmp.lt.u32.totalorder %s89_s0, %s144_s1 }
  0x20   :  { %p95_p1 = pnand %p93_p0, %p90_p13 }
  0x22   :  { %98 = shalt.err (!%p95_p1)
}
  0x23   :  { %s107_s29 = smov 128   ;;  %s108_s30 = smov 8  }
  0x24   :  { %43 = dma.vmem_to_hbm [thread:$0]  %s38_s21, 256, %s144_s1, [#allocation4], %s107_s29, %s107_s29, %s108_s30  }
  0x25   :  { %101 = dma.done.wait [#allocation4], 256  }
  0x26   :  { %102 = vsyncadd [#allocation4], 4294967040 }
  0x27   :  { %47 = vsyncpa [#allocation3], 1 }
  0x28   :  { %48 = vsyncpa [#allocation4], 1 }

</bundles_post_ra>
